<compile_context>
chip_gen: v7x
topology: tpu7x:2x2x1
jax: 0.10.0
libtpu: 0.0.40
codegen_flags: <defaults>
</compile_context>

<pallas_src>
import functools
import math

import jax
import jax.numpy as jnp
import numpy as np
from jax.experimental import pallas as pl
from jax.experimental.pallas import tpu as pltpu


def _pe_add_kernel(x_ref, pe_ref, o_ref, *, batch):
    # x_ref, o_ref: (TS, B*D) lane-dense tiles; pe_ref: (TS, D) compact tile.
    pe = pe_ref[...]  # float32
    if batch > 1:
        # Replicate the per-position encoding across the batch segments of the
        # flattened lane axis: [pe_row, pe_row, ..., pe_row]  (B copies).
        pe = jnp.concatenate([pe] * batch, axis=-1)
    x = x_ref[...].astype(jnp.float32)
    o_ref[...] = (x + pe).astype(o_ref.dtype)


def _choose_block_rows(s, row_bytes, target_bytes=4 << 20):
    """Pick TS | S with TS % 8 == 0 (sublane-aligned) whose x-block stays
    under ~target_bytes, keeping >= 2 grid steps when possible (megacore)."""
    cap = max(1, min(s, target_bytes // max(row_bytes, 1)))
    if s >= 2:
        cap = min(cap, max(1, s // 2))
    for t in range(cap, 0, -1):
        if s % t == 0 and t % 8 == 0:
            return t
    if s >= 8 and s % 8 == 0:
        return 8          # smallest aligned divisor (block slightly over budget)
    return s              # single full-extent block is always layout-legal


def make_pe_table(max_len, d_model):
    """Build the (max_len, d_model) sin/cos table exactly as the PyTorch module."""
    assert d_model % 2 == 0, "d_model must be even (matches the reference init)"
    position = jnp.arange(max_len, dtype=jnp.float32)[:, None]            # (L, 1)
    div_term = jnp.exp(
        jnp.arange(0, d_model, 2, dtype=jnp.float32) * (-math.log(10000.0) / d_model)
    )                                                                     # (D/2,)
    ang = position * div_term                                             # (L, D/2)
    pe = jnp.zeros((max_len, d_model), dtype=jnp.float32)
    pe = pe.at[:, 0::2].set(jnp.sin(ang))
    pe = pe.at[:, 1::2].set(jnp.cos(ang))
    return pe


def positional_encoding_forward(x, pe_table):
    """x: (S, B, D); pe_table: (max_len, D) with max_len >= S.
    Returns x + pe[:S] broadcast over batch (eval-mode forward)."""
    s, b, d = x.shape
    assert pe_table.shape[0] >= s and pe_table.shape[1] == d

    # Slice in the wrapper: only the S rows we actually use ever reach the kernel.
    pe = pe_table[:s].astype(jnp.float32)                  # (S, D)
    # Flatten batch*feature onto the lane axis (free, row-major layout).
    x2 = x.reshape(s, b * d)

    out_dtype = jnp.promote_types(x.dtype, jnp.float32)
    row_bytes = b * d * jnp.dtype(out_dtype).itemsize
    ts = _choose_block_rows(s, row_bytes)
    grid = (s // ts,)

    out2 = pl.pallas_call(
        functools.partial(_pe_add_kernel, batch=b),
        out_shape=jax.ShapeDtypeStruct((s, b * d), out_dtype),
        grid=grid,
        in_specs=[
            pl.BlockSpec((ts, b * d), lambda i: (i, 0)),   # x tile (lane-dense)
            pl.BlockSpec((ts, d), lambda i: (i, 0)),       # pe tile (compact)
        ],
        out_specs=pl.BlockSpec((ts, b * d), lambda i: (i, 0)),
        compiler_params=pltpu.CompilerParams(
            dimension_semantics=("parallel",),
            vmem_limit_bytes=32 << 20,
        ),
    )(x2, pe)
    return out2.reshape(s, b, d)


def _reference(x, pe_table):
    s = x.shape[0]
    return x.astype(jnp.float32) + pe_table[:s][:, None, :]


if __name__ == "__main__":
    key = jax.random.PRNGKey(0)
    S, B, D = 16, 4, 32          # (seq_len, batch, d_model) as the forward implies
    MAX_LEN = 5000               # module default

    x = jax.random.normal(key, (S, B, D), dtype=jnp.float32)
    pe_table = make_pe_table(MAX_LEN, D)

    out = jax.block_until_ready(positional_encoding_forward(x, pe_table))
    ref = jax.block_until_ready(_reference(x, pe_table))

    assert out.shape == (S, B, D)
    np.testing.assert_allclose(np.asarray(out), np.asarray(ref), rtol=1e-6, atol=1e-6)

    print("KERNEL_OK")
</pallas_src>

<mosaic_0001>
module attributes {stable_mosaic.version = 11 : i64} {
  func.func @_pe_add_kernel(%arg0: i32, %arg1: memref<8x128xf32, #tpu.memory_space<vmem>>, %arg2: memref<8x32xf32, #tpu.memory_space<vmem>>, %arg3: memref<8x128xf32, #tpu.memory_space<vmem>>) attributes {dimension_semantics = [#tpu.dimension_semantics<parallel>], iteration_bounds = array<i64: 2>, scalar_prefetch = 0 : i64, scratch_operands = 0 : i64, tpu.core_type = #tpu.core_type<tc>, window_params = [{transform_indices = @transform_0, window_bounds = array<i64: 8, 128>}, {transform_indices = @transform_1, window_bounds = array<i64: 8, 32>}, {transform_indices = @transform_2, window_bounds = array<i64: 8, 128>}]} {
    %c0 = arith.constant 0 : index
    %c0_0 = arith.constant 0 : index
    %0 = vector.load %arg2[%c0, %c0_0] : memref<8x32xf32, #tpu.memory_space<vmem>>, vector<8x32xf32>
    %1 = tpu.concatenate %0, %0, %0, %0 in 1 : vector<8x32xf32>, vector<8x32xf32>, vector<8x32xf32>, vector<8x32xf32> -> vector<8x128xf32>
    %c0_1 = arith.constant 0 : index
    %c0_2 = arith.constant 0 : index
    %2 = vector.load %arg1[%c0_1, %c0_2] : memref<8x128xf32, #tpu.memory_space<vmem>>, vector<8x128xf32>
    %3 = arith.addf %2, %1 : vector<8x128xf32>
    %c0_3 = arith.constant 0 : index
    %c0_4 = arith.constant 0 : index
    %4 = vector.load %arg3[%c0_3, %c0_4] : memref<8x128xf32, #tpu.memory_space<vmem>>, vector<8x128xf32>
    tpu.vector_store %arg3[%c0_3, %c0_4], %3 {strides = array<i32>} : memref<8x128xf32, #tpu.memory_space<vmem>>, vector<8x128xf32>,
    return
  }
  func.func @transform_0(%arg0: i32) -> (i32, i32) {
    %c0_i32 = arith.constant 0 : i32
    %c0_i32_0 = arith.constant 0 : i32
    return %arg0, %c0_i32 : i32, i32
  }
  func.func @transform_1(%arg0: i32) -> (i32, i32) {
    %c0_i32 = arith.constant 0 : i32
    %c0_i32_0 = arith.constant 0 : i32
    return %arg0, %c0_i32 : i32, i32
  }
  func.func @transform_2(%arg0: i32) -> (i32, i32) {
    %c0_i32 = arith.constant 0 : i32
    %c0_i32_0 = arith.constant 0 : i32
    return %arg0, %c0_i32 : i32, i32
  }
}

</mosaic_0001>

<bundles_post_ra>
// kernel: tpu_custom_call.1
= control target key start
LH: loop header
LB: loop body
LE: loop exit
PB: predicated region body
PF: predicated region fallthrough
CT: control target
= control target key end

     0   :  { %7 = vsyncpa [#allocation3], 0  ;;  %s759_s0 = inlined_call_operand.hbm [shape: f32[16,128], index: 0, kind: input, shape index: {}]   ;;  %s760_s1 = inlined_call_operand.hbm [shape: f32[16,32], index: 1, kind: input, shape index: {}]   ;;  %s761_s2 = inlined_call_operand.hbm [shape: f32[16,128], index: 2, kind: output, shape index: {}]  }
   0x1   :  { %9 = vsyncpa [#allocation3 + $0x1], 0 }
   0x2   :  { %10 = vsyncpa [#allocation6], 0 }
   0x3   :  { %12 = vsyncpa [#allocation6 + $0x1], 0 }
   0x4   :  { %13 = vsyncpa [#allocation4], 0 }
   0x5   :  { %15 = vsyncpa [#allocation4 + $0x1], 0  ;;  %s545_s9 = smov 0   ;;  %s547_s10 = smov 0  }
   0x6   :  { %s549_s11 = smov 0   ;;  %s551_s12 = smov 0  }
   0x7 LB: > { %s566_s13 = sadd.s32 4294967295, %s522_s12   ;;  %s323_s14 = sadd.s32 4294967294, %s522_s12   ;;  %s522_s12 = sphi %s551_s12, %s780_s12   ;;  %s518_s11 = sphi %s549_s11, %s779_s11   ;;  %s514_s10 = sphi %s547_s10, %s778_s10   ;;  %s510_s9 = sphi %s545_s9, %s777_s9  }
   0x8   : > { %s570_s15 = sadd.s32 1, %s522_s12   ;;  %s28_s16 = sadd.s32 1, %s518_s11 }
   0x9   : > { %s25_s17 = ssub.s32 %s522_s12, %s570_s15  ;;  %p35_p0 = scmp.ne.s32.totalorder %s518_s11, %s514_s10 }
   0xa   : > { %p26_p1 = scmp.eq.s32.totalorder %s25_s17, 0  ;;  %p36_p2 = scmp.eq.s32.totalorder %s522_s12, 0 }
   0xb   : > { %p41_p3 = scmp.ne.s32.totalorder %s514_s10, %s510_s9  ;;  %p42_p4 = scmp.eq.s32.totalorder %s566_s13, 0 }
   0xc   : > { %s582_s18 = scalar_select %p26_p1, %s518_s11, %s28_s16  }
   0xd   : > { %p584_p5 = por %p36_p2, %p35_p0  ;;  %p588_p6 = por %p42_p4, %p41_p3 }
   0xe   : > { %p91_p7 = scmp.eq.s32.totalorder %s566_s13, 1  ;;  %p97_p8 = scmp.eq.s32.totalorder %s323_s14, 1 }
   0xf   : > { %s765_s20 = scalar_select %p588_p6, 1, 0 }
  0x10   : > { %p355_p10 = scmp.lt.s32.totalorder %s522_s12, 2  ;;  %p595_p11 = por %p91_p7, %p35_p0 }
  0x11   : > { %p599_p12 = por %p97_p8, %p41_p3  ;;  %s604_s23 = sand.u32 1, %s518_s11  }
  0x12   : > { %s766_s21 = scalar_select %p595_p11, 1, 0 }
  0x13   : > { %s767_s22 = scalar_select %p599_p12, 1, 0 }
  0x14   : > { %s327_s24 = sshll.u32 %s522_s12, 7  ;;  %s326_s25 = sshll.u32 %s604_s23, 3 }
  0x15   : > { %s613_s28 = scalar_lea.hbm %s759_s0, %s327_s24  ;;  %s121_s29 = scalar_lea.vmem [#allocation2], %s326_s25 }
  0x16   : > { %s128_s30 = sshll.u32 %s121_s29, 4  ;;  %p619_p13 = pnand %p355_p10, %p584_p5  ;;  %s623_s30 = int_to_ptr.vmem [resolvable:$true] %s128_s30 }
  0x17   : > { %s118_s4 = scalar_lea.sflag [#allocation3], %s604_s23  ;;  %s392_s5 = scalar_lea.hbm %s613_s28, 128 }
  0x18   : > { %p393_p2 = scmp.ne.s32.totalorder %s613_s28, %s392_s5  ;;  %p394_p3 = pneg %p619_p13 }
  0x19   : > { %s397_s8 = scalar_lea.hbm %s759_s0, 256  ;;  %p398_p5 = scmp.lt.u32.totalorder %s613_s28, %s759_s0 }
  0x1a   : > { %p395_p4 = pnand %p394_p3, %p393_p2  ;;  %p399_p8 = scmp.lt.u32.totalorder %s397_s8, %s392_s5 }
  0x1b   : > { %p401_p9 = scmp.lt.u32.totalorder %s392_s5, %s613_s28 }
  0x1c   : > { %p396_p7 = pneg %p395_p4  ;;  %p400_p10 = por %p399_p8, %p398_p5 }
  0x1e   : > { %p402_p0 = por %p401_p9, %p400_p10 }
  0x20   : > { %p403_p1 = pnand %p402_p0, %p396_p7 }
  0x22   : > { %406 = shalt.err (!%p403_p1)
}
  0x23   : > { %s407_s17 = scalar_lea.vmem %s623_s30, 128  ;;  %s524_s19 = smov [#allocation2]  }
  0x24   : > { %p408_p2 = scmp.ne.s32.totalorder %s623_s30, %s407_s17  ;;  %s412_s26 = sshll.u32 %s524_s19, 4  ;;  %s413_s26 = int_to_ptr.vmem [resolvable:$false] %s412_s26 }
  0x25   : > { %s414_s27 = scalar_lea.vmem %s413_s26, 256  ;;  %p415_p11 = scmp.lt.s32.totalorder %s623_s30, %s413_s26 }
  0x26   : > { %p410_p4 = pnand %p408_p2, %p394_p3  ;;  %p416_p5 = scmp.lt.s32.totalorder %s414_s27, %s407_s17 }
  0x28   : > { %p411_p12 = pneg %p410_p4  ;;  %p417_p8 = por %p416_p5, %p415_p11 }
  0x2a   : > { %p418_p9 = pnand %p417_p8, %p411_p12 }
  0x2c   : > { %421 = shalt.err (!%p418_p9)
}
  0x2d   : > { %347 = dma.hbm_to_vmem [thread:$0]  (!%p619_p13), %s613_s28, 128, %s623_s30, %s118_s4  }
  0x2e   : > { %p769_p0 = scmp.lt.s32.totalorder %s522_s12, 3  ;;  %p770_p1 = scmp.ge.s32.totalorder %s522_s12, 1 }
  0x2f   : > { %s666_s7 = scalar_lea.hbm %s760_s1, %s327_s24  ;;  %s139_s8 = scalar_lea.vmem [#allocation5], %s326_s25 }
  0x30   : > { %p657_p7 = pnand %p770_p1, %p769_p0  ;;  %s146_s14 = sshll.u32 %s139_s8, 4  ;;  %s147_s14 = int_to_ptr.vmem [resolvable:$true] %s146_s14 }
  0x31   : > { %s136_s28 = scalar_lea.sflag [#allocation6], %s604_s23  ;;  %s422_s30 = scalar_lea.hbm %s666_s7, 128 }
  0x32   : > { %s771_s29 = scalar_select %p657_p7, 1, 0 }
  0x33   : > { %p423_p11 = scmp.ne.s32.totalorder %s666_s7, %s422_s30  ;;  %s427_s24 = scalar_lea.hbm %s760_s1, 256 }
  0x34   : > { %p428_p2 = scmp.lt.u32.totalorder %s666_s7, %s760_s1  ;;  %p429_p4 = scmp.lt.u32.totalorder %s427_s24, %s422_s30 }
  0x35   : > { %p425_p12 = pnand %p423_p11, %p394_p3  ;;  %p431_p8 = scmp.lt.u32.totalorder %s422_s30, %s666_s7 }
  0x36   : > { %p430_p5 = por %p429_p4, %p428_p2 }
  0x37   : > { %p426_p10 = pneg %p425_p12 }
  0x38   : > { %p432_p9 = por %p431_p8, %p430_p5 }
  0x3a   : > { %p433_p0 = pnand %p432_p9, %p426_p10 }
  0x3c   : > { %436 = shalt.err (!%p433_p0)
}
  0x3d   : > { %s437_s23 = scalar_lea.vmem %s147_s14, 128  ;;  %s525_s25 = smov [#allocation5]  }
  0x3e   : > { %p438_p1 = scmp.ne.s32.totalorder %s147_s14, %s437_s23  ;;  %s442_s26 = sshll.u32 %s525_s25, 4  ;;  %s443_s26 = int_to_ptr.vmem [resolvable:$false] %s442_s26 }
  0x3f   : > { %s444_s27 = scalar_lea.vmem %s443_s26, 256  ;;  %p445_p6 = scmp.lt.s32.totalorder %s147_s14, %s443_s26 }
  0x40   : > { %p440_p11 = pnand %p438_p1, %p394_p3  ;;  %p446_p7 = scmp.lt.s32.totalorder %s444_s27, %s437_s23 }
  0x42   : > { %p441_p12 = pneg %p440_p11  ;;  %p447_p2 = por %p446_p7, %p445_p6 }
  0x44   : > { %p448_p4 = pnand %p447_p2, %p441_p12 }
  0x46   : > { %451 = shalt.err (!%p448_p4)
}
  0x47   : > { %350 = dma.hbm_to_vmem [thread:$0]  (!%p619_p13), %s666_s7, 128, %s147_s14, %s136_s28  }
  0x48   : > { %p772_p10 = scmp.ne.s32.totalorder %s771_s29, 0 }
  0x49   : > { %s693_s5 = sand.u32 (!%p772_p10), 1, %s514_s10   ;;  %p773_p6 = scmp.ne.s32.totalorder (!%p772_p10), %s765_s20, 0 }
  0x4a   : > { %155 = sbr.rel (%p772_p10) target bundleno = 222 (0xde), region = 28  ;;  %s696_s6 = sshll.u32 (!%p772_p10), %s693_s5, 3 }
  0x4b   : > { %s158_s8 = scalar_lea.sflag (!%p772_p10), [#allocation3], %s693_s5  ;;  %s161_s30 = scalar_lea.vmem (!%p772_p10), [#allocation2], %s696_s6 }
  0x51   : > { %497 = dma.done.wait (%p773_p6), %s158_s8, 128  }
  0x52   : > { %499 = vsyncadd (%p773_p6), %s158_s8, 4294967168  ;;  %s167_s3 = scalar_lea.sflag [#allocation6], %s693_s5  ;;  %s170_s29 = scalar_lea.vmem [#allocation5], %s696_s6 }
  0x53   : > { %501 = dma.done.wait (%p773_p6), %s167_s3, 128  }
  0x54   : > { %503 = vsyncadd (%p773_p6), %s167_s3, 4294967168  ;;  %v196_v0 = vld [vmem:[%s170_s29] sm:$0xff]  ;;  %s526_s7 = smov 32   ;;  %s527_s14 = smov 96   ;;  %vm207_vm0 = vcmask 261120   ;;  %vm209_vm1 = vcmask 523264  }
  0x55   : > { %198 = vrot.lane.b32.xlu0 %v196_v0, %s526_s7  ;;  %204 = vrot.lane.b32.xlu1 %v196_v0, %s527_s14  ;;  %s528_s28 = smov 64   ;;  %vm211_vm2 = vcmask 785408   ;;  %v213_v5 = vld [vmem:[%s161_s30] sm:$0xff]  ;;  %s335_s20 = sshll.u32 %s566_s13, 7 }
  0x56   : > { %s195_s4 = scalar_lea.vmem [#allocation7], %s696_s6  ;;  %s715_s19 = scalar_lea.hbm %s761_s2, %s335_s20 }
  0x57   : > { %s230_s16 = sshll.u32 %s195_s4, 4  ;;  %s217_s23 = scalar_lea.sflag [#allocation4], %s693_s5  ;;  %s717_s16 = int_to_ptr.vmem [resolvable:$true] %s230_s16 }
  0x58   : > { %s452_s25 = scalar_lea.vmem %s717_s16, 128  ;;  %p774_p3 = scmp.ne.s32.totalorder %s766_s21, 0 }
  0x59   : > { %201 = vrot.lane.b32.xlu0 %v196_v0, %s528_s28  ;;  %p453_p13 = scmp.ne.s32.totalorder %s717_s16, %s452_s25  ;;  %s529_s13 = smov [#allocation7]  }
  0x5a   : > { %s456_s26 = sshll.u32 %s529_s13, 4  ;;  %s457_s26 = int_to_ptr.vmem [resolvable:$false] %s456_s26 }
  0x5b   : > { %p454_p7 = pnand %p453_p13, %p774_p3  ;;  %s458_s27 = scalar_lea.vmem %s457_s26, 256 }
  0x5c   : > { %p459_p8 = scmp.lt.s32.totalorder %s717_s16, %s457_s26  ;;  %p460_p9 = scmp.lt.s32.totalorder %s458_s27, %s452_s25 }
  0x5d   : > { %p455_p5 = pneg %p454_p7 }
  0x5e   : > { %p461_p0 = por %p460_p9, %p459_p8 }
  0x60   : > { %p462_p1 = pnand %p461_p0, %p455_p5 }
  0xc7   : > { %v199_v1 = vpop.permute.xlu0 %198  ;;  %v205_v2 = vpop.permute.xlu1 %204 }
  0xc8   : > { %v208_v3 = vsel %vm207_vm0, %v196_v0, %v199_v1 }
  0xcb   : > { %v202_v4 = vpop.permute.xlu0 %201 }
  0xcc   : > { %v210_v6 = vsel %vm209_vm1, %v208_v3, %v202_v4 }
  0xcd   : > { %v212_v7 = vsel %vm211_vm2, %v210_v6, %v205_v2 }
  0xce   : > { %v214_v8 = vadd.f32 %v213_v5, %v212_v7 }
  0xd0   : > { %215 = vst [vmem:[%s195_s4] sm:$0xff] %v214_v8 }
  0xd1   : > { %465 = shalt.err (!%p462_p1)
}
  0xd2   : > { %s466_s5 = scalar_lea.hbm %s715_s19, 128  ;;  %s470_s30 = scalar_lea.hbm %s761_s2, 256 }
  0xd3   : > { %p467_p11 = scmp.ne.s32.totalorder %s715_s19, %s466_s5  ;;  %p471_p4 = scmp.lt.u32.totalorder %s715_s19, %s761_s2 }
  0xd4   : > { %p472_p10 = scmp.lt.u32.totalorder %s470_s30, %s466_s5  ;;  %p474_p13 = scmp.lt.u32.totalorder %s466_s5, %s715_s19 }
  0xd5   : > { %p468_p12 = pnand %p467_p11, %p774_p3 }
  0xd6   : > { %p473_p6 = por %p472_p10, %p471_p4 }
  0xd7   : > { %p469_p2 = pneg %p468_p12 }
  0xd8   : > { %p475_p7 = por %p474_p13, %p473_p6 }
  0xda   : > { %p476_p5 = pnand %p475_p7, %p469_p2 }
  0xdc   : > { %479 = shalt.err (!%p476_p5)
}
  0xdd   : > { %342 = dma.vmem_to_hbm [thread:$0]  (%p774_p3), %s717_s16, 128, %s715_s19, %s217_s23  }
  0xde PF: > { %s242_s7 = sand.u32 1, %s510_s9   ;;  %p775_p8 = scmp.ne.s32.totalorder %s767_s22, 0 }
  0xdf   : > { %p776_p9 = scmp.ge.s32.totalorder %s522_s12, 2  ;;  %s243_s14 = scalar_lea.sflag [#allocation4], %s242_s7 }
  0xe1   : > { %p352_p0 = pnand %p776_p9, %p775_p8 }
  0xe3   : > { %505 = dma.done.wait (!%p352_p0), %s243_s14, 128  }
  0xe4   : > { %507 = vsyncadd (!%p352_p0), %s243_s14, 4294967168  ;;  %p18_p1 = scmp.ge.s32.totalorder %s570_s15, 4   ;;  %s777_s9 = smov %s514_s10 }
  0xe5   : > { %s778_s10 = smov %s518_s11  ;;  %s779_s11 = smov %s582_s18 }
  0xe6   : > { %s780_s12 = smov %s570_s15  ;;  %20 = sbr.rel (!%p18_p1) target bundleno = 7 (0x7), region = 86 }
  0xed   :  { %248 = vsyncpa [#allocation3], 1 }
  0xee   :  { %250 = vsyncpa [#allocation3 + $0x1], 1 }
  0xef   :  { %251 = vsyncpa [#allocation6], 1 }
  0xf0   :  { %253 = vsyncpa [#allocation6 + $0x1], 1 }
  0xf1   :  { %254 = vsyncpa [#allocation4], 1 }
  0xf2   :  { %256 = vsyncpa [#allocation4 + $0x1], 1 }

</bundles_post_ra>
